<compile_context>
chip_gen: v5e
topology: v5e:2x2
jax: 0.10.0
libtpu: 0.0.40
codegen_flags: <defaults>
</compile_context>

<pallas_src>
import functools

import jax
import jax.numpy as jnp
from jax import lax
from jax.experimental import pallas as pl
from jax.experimental.pallas import tpu as pltpu

LANE = 128
SUBLANE = 8
TARGET_BLOCK_BYTES = 2 * 1024 * 1024        # per input, per pipeline buffer (~86% HBM roofline)
VMEM_LIMIT_BYTES = 32 * 1024 * 1024         # explicit: > v5e 16 MiB scoped default, < v7x 64 MiB physical

TWO_PI = 6.283185307179586
INV_TWO_PI = 0.15915494309189535


def _wrapped_abs(pred_vals, targ_vals):
    """|atan2(sin(d), cos(d))| via a trig-free wrap of d to [-pi, pi] (computed in f32)."""
    d = pred_vals.astype(jnp.float32) - targ_vals.astype(jnp.float32)
    k = jnp.floor(d * INV_TWO_PI + 0.5)         # round-to-nearest; ties only at |d|=pi (abs identical)
    return jnp.abs(d - TWO_PI * k)


def _fold_to_tile(a, block_rows):
    """Fold a (block_rows, 128) f32 block into one (8, 128) partial-sum tile."""
    if block_rows % SUBLANE == 0:
        # Groups of 8 consecutive sublanes align with the (8,128) vreg tile:
        # the reduce over the leading axis is a chain of plain vreg adds (VPU only).
        return a.reshape(block_rows // SUBLANE, SUBLANE, LANE).sum(axis=0)
    # Tiny single-block inputs (block_rows == rows, not a multiple of 8):
    # one cross-sublane reduce, placed into row 0 of an (8,128) tile.
    s = jnp.sum(a, axis=0, keepdims=True)                                   # (1, LANE)
    rowsel = lax.broadcasted_iota(jnp.int32, (SUBLANE, 1), 0) == 0          # (8, 1)
    return jnp.where(rowsel, s, 0.0)                                        # (8, LANE) f32


def _partial_sum_kernel(pred_ref, targ_ref, part_ref, *, block_rows, valid_rows, needs_mask):
    i = pl.program_id(0)
    a = _wrapped_abs(pred_ref[...], targ_ref[...])

    if needs_mask:  # static: only compiled in when the grid has a ragged tail block
        last = pl.num_programs(0) - 1

        @pl.when(i < last)
        def _():
            part_ref[...] = _fold_to_tile(a, block_rows)

        @pl.when(i == last)
        def _():
            lim = valid_rows - i * block_rows
            row = lax.broadcasted_iota(jnp.int32, (block_rows, 1), 0)       # (rows,1), broadcast over lanes
            part_ref[...] = _fold_to_tile(jnp.where(row < lim, a, 0.0), block_rows)
    else:
        part_ref[...] = _fold_to_tile(a, block_rows)


def _elemwise_kernel(pred_ref, targ_ref, out_ref):
    out_ref[...] = _wrapped_abs(pred_ref[...], targ_ref[...]).astype(out_ref.dtype)


def _to_slab(x):
    """Flatten to a lane-dense (rows, 128) slab; zero-pad only if needed (pad wraps to 0 loss)."""
    flat = x.reshape(-1)
    n = flat.shape[0]
    pad = (-n) % LANE
    if pad:
        flat = jnp.pad(flat, (0, pad))
    return flat.reshape(-1, LANE), n


def angle_loss(pred, target, reduction="mean", *, block_bytes=TARGET_BLOCK_BYTES):
    assert pred.shape == target.shape, "pred/target shape mismatch"
    if reduction not in ("mean", "sum", "none"):
        raise ValueError(f"unknown reduction: {reduction}")

    orig_shape = pred.shape
    out_dtype = jnp.result_type(pred.dtype, target.dtype)

    pred2, n = _to_slab(pred)
    targ2, _ = _to_slab(target)
    rows = pred2.shape[0]

    # Byte-budgeted block rows, rounded to the dtype-native sublane tile.
    item_p = jnp.dtype(pred2.dtype).itemsize
    item_t = jnp.dtype(targ2.dtype).itemsize
    tile = max(SUBLANE, 32 // item_p, 32 // item_t)          # 8 f32 / 16 bf16 / 32 int8
    raw = block_bytes // (LANE * max(item_p, item_t))
    budget_rows = max(tile, (raw // tile) * tile)
    block_rows = rows if rows <= budget_rows else budget_rows  # full extent for small inputs
    grid_n = pl.cdiv(rows, block_rows)

    in_specs = [
        pl.BlockSpec((block_rows, LANE), lambda i: (i, 0)),
        pl.BlockSpec((block_rows, LANE), lambda i: (i, 0)),
    ]
    cparams = pltpu.CompilerParams(
        dimension_semantics=("parallel",),                    # independent steps -> v7x megacore
        vmem_limit_bytes=VMEM_LIMIT_BYTES,
    )

    if reduction == "none":
        out = pl.pallas_call(
            _elemwise_kernel,
            out_shape=jax.ShapeDtypeStruct((rows, LANE), out_dtype),
            grid_spec=pltpu.PrefetchScalarGridSpec(
                num_scalar_prefetch=0,
                grid=(grid_n,),
                in_specs=in_specs,
                out_specs=pl.BlockSpec((block_rows, LANE), lambda i: (i, 0)),
            ),
            compiler_params=cparams,
        )(pred2, targ2)
        flat = out.reshape(-1)
        if flat.shape[0] != n:
            flat = flat[:n]
        return flat.reshape(orig_shape)

    # mean / sum: one (8,128) f32 partial per grid step; final reduce outside the kernel.
    needs_mask = (rows % block_rows) != 0
    kernel = functools.partial(
        _partial_sum_kernel,
        block_rows=block_rows,
        valid_rows=rows,
        needs_mask=needs_mask,
    )
    partials = pl.pallas_call(
        kernel,
        out_shape=jax.ShapeDtypeStruct((grid_n * SUBLANE, LANE), jnp.float32),
        grid_spec=pltpu.PrefetchScalarGridSpec(
            num_scalar_prefetch=0,
            grid=(grid_n,),
            in_specs=in_specs,
            out_specs=pl.BlockSpec((SUBLANE, LANE), lambda i: (i, 0)),
        ),
        compiler_params=cparams,
    )(pred2, targ2)

    total = jnp.sum(partials)                                 # tiny (grid*8, 128) reduce
    if reduction == "mean":
        return total / jnp.float32(n)
    return total


def _reference(pred, target, reduction="mean"):
    d = pred.astype(jnp.float32) - target.astype(jnp.float32)
    out = jnp.abs(jnp.arctan2(jnp.sin(d), jnp.cos(d)))
    if reduction == "mean":
        return jnp.mean(out)
    if reduction == "sum":
        return jnp.sum(out)
    return out


if __name__ == "__main__":
    key = jax.random.PRNGKey(0)
    k1, k2, k3, k4, k5, k6 = jax.random.split(key, 6)

    # Primary: small angle-regression head output (B, C, H, W).
    pred = jax.random.uniform(k1, (2, 4, 16, 16), jnp.float32, -6.0, 6.0)
    target = jax.random.uniform(k2, (2, 4, 16, 16), jnp.float32, -6.0, 6.0)

    out_mean = jax.block_until_ready(angle_loss(pred, target, "mean"))
    out_sum = jax.block_until_ready(angle_loss(pred, target, "sum"))
    out_none = jax.block_until_ready(angle_loss(pred, target, "none"))

    assert jnp.allclose(out_mean, _reference(pred, target, "mean"), atol=1e-4, rtol=1e-4)
    assert jnp.allclose(out_sum, _reference(pred, target, "sum"), atol=1e-2, rtol=1e-4)
    assert out_none.shape == pred.shape
    assert jnp.allclose(out_none, _reference(pred, target, "none"), atol=1e-4, rtol=1e-4)

    # Ragged numel (not a multiple of 128): lane pad + single full-extent block.
    p2 = jax.random.uniform(k3, (3, 5, 7), jnp.float32, -8.0, 8.0)
    t2 = jax.random.uniform(k4, (3, 5, 7), jnp.float32, -8.0, 8.0)
    assert jnp.allclose(angle_loss(p2, t2, "mean"), _reference(p2, t2, "mean"), atol=1e-4, rtol=1e-4)
    assert jnp.allclose(angle_loss(p2, t2, "none"), _reference(p2, t2, "none"), atol=1e-4, rtol=1e-4)

    # Multi-block grid with a ragged tail: a tiny block budget forces grid=2; the last
    # block is masked in the sum path and OOB-write-dropped in the 'none' path.
    p3 = jax.random.uniform(k5, (2, 5, 9, 16), jnp.float32, -6.0, 6.0)
    t3 = jax.random.uniform(k6, (2, 5, 9, 16), jnp.float32, -6.0, 6.0)
    small = SUBLANE * LANE * 4  # 8-row f32 blocks
    assert jnp.allclose(angle_loss(p3, t3, "mean", block_bytes=small),
                        _reference(p3, t3, "mean"), atol=1e-4, rtol=1e-4)
    assert jnp.allclose(angle_loss(p3, t3, "sum", block_bytes=small),
                        _reference(p3, t3, "sum"), atol=1e-2, rtol=1e-4)
    assert jnp.allclose(angle_loss(p3, t3, "none", block_bytes=small),
                        _reference(p3, t3, "none"), atol=1e-4, rtol=1e-4)

    # bf16 inputs flow through HBM at half width; f32 cast happens in-VMEM (dtype tile = 16).
    pb = pred.astype(jnp.bfloat16)
    tb = target.astype(jnp.bfloat16)
    assert jnp.allclose(angle_loss(pb, tb, "mean"), _reference(pb, tb, "mean"), atol=1e-3, rtol=1e-3)

    print("KERNEL_OK")
</pallas_src>

<mosaic_0001>
module attributes {stable_mosaic.version = 11 : i64} {
  func.func @_partial_sum_kernel(%arg0: i32, %arg1: memref<16x128xf32, #tpu.memory_space<vmem>>, %arg2: memref<16x128xf32, #tpu.memory_space<vmem>>, %arg3: memref<8x128xf32, #tpu.memory_space<vmem>>) attributes {dimension_semantics = [#tpu.dimension_semantics<parallel>], iteration_bounds = array<i64: 1>, scalar_prefetch = 0 : i64, scratch_operands = 0 : i64, tpu.core_type = #tpu.core_type<tc>, window_params = [{transform_indices = @transform_0, window_bounds = array<i64: 16, 128>}, {transform_indices = @transform_1, window_bounds = array<i64: 16, 128>}, {transform_indices = @transform_2, window_bounds = array<i64: 8, 128>}]} {
    %c0 = arith.constant 0 : index
    %c0_0 = arith.constant 0 : index
    %0 = vector.load %arg1[%c0, %c0_0] : memref<16x128xf32, #tpu.memory_space<vmem>>, vector<16x128xf32>
    %c0_1 = arith.constant 0 : index
    %c0_2 = arith.constant 0 : index
    %1 = vector.load %arg2[%c0_1, %c0_2] : memref<16x128xf32, #tpu.memory_space<vmem>>, vector<16x128xf32>
    %2 = arith.subf %0, %1 : vector<16x128xf32>
    %cst = arith.constant 0.159154937 : f32
    %3 = vector.broadcast %cst : f32 to vector<16x128xf32>
    %4 = arith.mulf %2, %3 : vector<16x128xf32>
    %cst_3 = arith.constant 5.000000e-01 : f32
    %5 = vector.broadcast %cst_3 : f32 to vector<16x128xf32>
    %6 = arith.addf %4, %5 : vector<16x128xf32>
    %7 = math.floor %6 : vector<16x128xf32>
    %cst_4 = arith.constant 6.28318548 : f32
    %8 = vector.broadcast %cst_4 : f32 to vector<16x128xf32>
    %9 = arith.mulf %8, %7 : vector<16x128xf32>
    %10 = arith.subf %2, %9 : vector<16x128xf32>
    %11 = math.absf %10 : vector<16x128xf32>
    %12 = vector.shape_cast %11 : vector<16x128xf32> to vector<2x8x128xf32>
    %cst_5 = arith.constant dense<0.000000e+00> : vector<8x128xf32>
    %13 = vector.multi_reduction <add>, %12, %cst_5 [0] : vector<2x8x128xf32> to vector<8x128xf32>
    %c0_6 = arith.constant 0 : index
    %c0_7 = arith.constant 0 : index
    %14 = vector.load %arg3[%c0_6, %c0_7] : memref<8x128xf32, #tpu.memory_space<vmem>>, vector<8x128xf32>
    tpu.vector_store %arg3[%c0_6, %c0_7], %13 {strides = array<i32>} : memref<8x128xf32, #tpu.memory_space<vmem>>, vector<8x128xf32>,
    return
  }
  func.func @transform_0(%arg0: i32) -> (i32, i32) {
    %c0_i32 = arith.constant 0 : i32
    %c0_i32_0 = arith.constant 0 : i32
    return %arg0, %c0_i32 : i32, i32
  }
  func.func @transform_1(%arg0: i32) -> (i32, i32) {
    %c0_i32 = arith.constant 0 : i32
    %c0_i32_0 = arith.constant 0 : i32
    return %arg0, %c0_i32 : i32, i32
  }
  func.func @transform_2(%arg0: i32) -> (i32, i32) {
    %c0_i32 = arith.constant 0 : i32
    %c0_i32_0 = arith.constant 0 : i32
    return %arg0, %c0_i32 : i32, i32
  }
}

</mosaic_0001>

<bundles_post_ra>
// kernel: tpu_custom_call.1
= control target key start
LH: loop header
LB: loop body
LE: loop exit
PB: predicated region body
PF: predicated region fallthrough
CT: control target
= control target key end

     0   :  { %7 = vsyncpa [#allocation3], 0  ;;  %s194_s0 = inlined_call_operand.hbm [shape: f32[16,128], index: 0, kind: input, shape index: {}]   ;;  %s195_s1 = inlined_call_operand.hbm [shape: f32[16,128], index: 1, kind: input, shape index: {}]   ;;  %s196_s2 = inlined_call_operand.hbm [shape: f32[8,128], index: 2, kind: output, shape index: {}]  }
   0x1   :  { %8 = vsyncpa [#allocation6], 0 }
   0x2   :  { %9 = vsyncpa [#allocation4], 0  ;;  %s14_s11 = sshll.u32 %s194_s0, 4  ;;  %s165_s12 = smov [#allocation2]   ;;  %s15_s11 = int_to_ptr.hbm [resolvable:$true] %s14_s11 }
   0x3   :  { %s16_s13 = sshll.u32 %s165_s12, 4  ;;  %s27_s16 = sshll.u32 %s195_s1, 4  ;;  %s17_s13 = int_to_ptr.vmem [resolvable:$true] %s16_s13  ;;  %s28_s16 = int_to_ptr.hbm [resolvable:$true] %s27_s16 }
   0x4   :  { %s166_s17 = smov 128   ;;  %s167_s18 = smov 8  }
   0x5   :  { %22 = dma.hbm_to_vmem [thread:$0]  %s15_s11, 256, %s17_s13, [#allocation3], %s166_s17, %s166_s17, %s167_s18  }
   0x6   :  { %s168_s19 = smov [#allocation5]  }
   0x7   :  { %s29_s20 = sshll.u32 %s168_s19, 4  ;;  %s30_s20 = int_to_ptr.vmem [resolvable:$true] %s29_s20 }
   0x8   :  { %35 = dma.hbm_to_vmem [thread:$0]  %s28_s16, 256, %s30_s20, [#allocation6], %s166_s17, %s166_s17, %s167_s18  }
   0x9   :  { %159 = dma.done.wait [#allocation3], 256  }
   0xa   :  { %160 = vsyncadd [#allocation3], 4294967040 }
   0xb   :  { %161 = dma.done.wait [#allocation6], 256  }
   0xc   :  { %162 = vsyncadd [#allocation6], 4294967040  ;;  %v44_v0 = vld [vmem:[#allocation2] sm:$0xff]  ;;  %v45_v1 = vld [vmem:[#allocation2 + $0x8] sm:$0xff]  ;;  %s169_s0 = smov [#allocation7]   ;;  %s71_s23 = sshll.u32 %s196_s2, 4  ;;  %s72_s23 = int_to_ptr.hbm [resolvable:$true] %s71_s23 }
   0xd   :  { %v46_v2 = vld [vmem:[#allocation5] sm:$0xff]  ;;  %v47_v3 = vld [vmem:[#allocation5 + $0x8] sm:$0xff]  ;;  %s69_s1 = sshll.u32 %s169_s0, 4  ;;  %s70_s1 = int_to_ptr.vmem [resolvable:$true] %s69_s1 }
   0xe   :  { %v48_v4 = vsub.f32 %v44_v0, %v46_v2  ;;  %v49_v5 = vsub.f32 %v45_v1, %v47_v3 }
  0x10   :  { %v50_v6 = vmul.f32 0.15915494, %v48_v4  ;;  %v51_v7 = vmul.f32 0.15915494, %v49_v5 }
  0x12   :  { %v52_v8 = vadd.f32 0.5, %v50_v6  ;;  %v53_v9 = vadd.f32 0.5, %v51_v7 }
  0x14   :  { %v54_v10 = vfloor.f32 %v52_v8  ;;  %v55_v11 = vfloor.f32 %v53_v9 }
  0x16   :  { %v56_v12 = vmul.f32 6.2831855, %v54_v10  ;;  %v57_v13 = vmul.f32 6.2831855, %v55_v11 }
  0x18   :  { %v58_v14 = vsub.f32 %v48_v4, %v56_v12  ;;  %v59_v15 = vsub.f32 %v49_v5, %v57_v13 }
  0x1a   :  { %v60_v16 = vand.u32 2147483647, %v58_v14  ;;  %v61_v17 = vand.u32 2147483647, %v59_v15 }
  0x1c   :  { %v62_v18 = vadd.f32 %v61_v17, %v60_v16 }
  0x1e   :  { %63 = vst [vmem:[#allocation7] sm:$0xff] %v62_v18 }
  0x1f   :  { %74 = dma.vmem_to_hbm [thread:$0]  %s70_s1, 128, %s72_s23, [#allocation4]  }
  0x20   :  { %163 = dma.done.wait [#allocation4], 128  }
  0x21   :  { %164 = vsyncadd [#allocation4], 4294967168 }
  0x22   :  { %79 = vsyncpa [#allocation3], 1 }
  0x23   :  { %80 = vsyncpa [#allocation6], 1 }
  0x24   :  { %81 = vsyncpa [#allocation4], 1 }

</bundles_post_ra>
